<compile_context>
chip_gen: v7x
topology: tpu7x:2x2x1
jax: 0.10.0
libtpu: 0.0.40
codegen_flags: <defaults>
</compile_context>

<pallas_src>
import functools

import jax
import jax.numpy as jnp
from jax import lax
from jax.experimental import pallas as pl
from jax.experimental.pallas import tpu as pltpu

CLAMP_LO = 1e-12
CLAMP_HI = 1e12


def center_loss_kernel(x_ref, lab_ref, c_ref, o_ref, *, inv_batch):
    """One batch block of the CenterLoss forward.

    x_ref  : (TB, D)  float32  features for this batch block
    lab_ref: (TB, 1)  int32    labels for this batch block
    c_ref  : (C, D)   float32  class centers (resident across the grid)
    o_ref  : (1, 1)   float32  scalar loss accumulator (resident)
    """
    i = pl.program_id(0)

    @pl.when(i == 0)
    def _():
        o_ref[...] = jnp.zeros_like(o_ref)

    x = x_ref[...]                                                   # (TB, D)
    c = c_ref[...]                                                   # (C, D)
    tb, d = x.shape
    nc = c.shape[0]

    # ||x_i||^2 : lane reduce, natural (TB, 1) layout.
    x2 = jnp.sum(x * x, axis=1, keepdims=True)                       # (TB, 1)

    # ||c_j||^2 as a (1, C) row via a ones-matmul (avoids a relayout).
    c2_row = lax.dot_general(
        jnp.ones((1, d), jnp.float32), c * c,
        (((1,), (1,)), ((), ())),
        preferred_element_type=jnp.float32)                          # (1, C)

    # x . c_j on the MXU, contracting on D (centers kept untransposed).
    xc = lax.dot_general(
        x, c, (((1,), (1,)), ((), ())),
        preferred_element_type=jnp.float32)                          # (TB, C)

    distmat = x2 + c2_row - 2.0 * xc                                 # (TB, C)

    # one-hot mask from the integer labels
    class_ids = lax.broadcasted_iota(jnp.int32, (tb, nc), 1)
    mask = lab_ref[...] == class_ids                                 # (TB, C)
    dist = jnp.where(mask, distmat, 0.0)
    clamped = jnp.clip(dist, CLAMP_LO, CLAMP_HI)

    o_ref[...] += jnp.sum(clamped, keepdims=True)                    # (1, 1)

    @pl.when(i == pl.num_programs(0) - 1)
    def _():
        o_ref[...] = o_ref[...] * inv_batch


def center_loss(x, centers, labels, *, block_b=None):
    """loss = CenterLoss(feat_dim, num_classes).forward(x, labels)."""
    B, D = x.shape
    C, D2 = centers.shape
    assert D == D2
    if block_b is None:
        block_b = B
    assert B % block_b == 0, "batch must be a multiple of block_b"
    grid = (B // block_b,)

    x = x.astype(jnp.float32)
    centers = centers.astype(jnp.float32)
    labels2d = labels.astype(jnp.int32).reshape(B, 1)

    kernel = functools.partial(center_loss_kernel, inv_batch=1.0 / B)
    loss = pl.pallas_call(
        kernel,
        out_shape=jax.ShapeDtypeStruct((1, 1), jnp.float32),
        grid_spec=pltpu.PrefetchScalarGridSpec(
            num_scalar_prefetch=0,
            grid=grid,
            in_specs=[
                pl.BlockSpec((block_b, D), lambda i: (i, 0)),   # x block
                pl.BlockSpec((block_b, 1), lambda i: (i, 0)),   # labels block
                pl.BlockSpec((C, D), lambda i: (0, 0)),         # centers (resident)
            ],
            out_specs=pl.BlockSpec((1, 1), lambda i: (0, 0)),   # scalar accum
        ),
        compiler_params=pltpu.CompilerParams(
            dimension_semantics=("arbitrary",)),
    )(x, labels2d, centers)
    return loss[0, 0]


def center_loss_ref(x, centers, labels):
    """Pure-JAX reference mirroring the PyTorch module exactly."""
    B = x.shape[0]
    C = centers.shape[0]
    distmat = (jnp.sum(x * x, axis=1, keepdims=True)
               + jnp.sum(centers * centers, axis=1)[None, :]
               - 2.0 * jnp.matmul(x, centers.T, precision=lax.Precision.HIGHEST))
    mask = labels[:, None] == jnp.arange(C)[None, :]
    dist = jnp.where(mask, distmat, 0.0)
    return jnp.sum(jnp.clip(dist, CLAMP_LO, CLAMP_HI)) / B


if __name__ == "__main__":
    key = jax.random.PRNGKey(0)
    kx, kc, kl = jax.random.split(key, 3)

    # Small shapes implied by the module: x (batch, feat_dim),
    # centers (num_classes, feat_dim), integer labels in [0, num_classes).
    B, FEAT, NCLS = 16, 32, 10
    x = jax.random.normal(kx, (B, FEAT), jnp.float32)
    centers = jax.random.normal(kc, (NCLS, FEAT), jnp.float32)
    labels = jax.random.randint(kl, (B,), 0, NCLS, dtype=jnp.int32)

    loss = jax.jit(functools.partial(center_loss, block_b=8))(x, centers, labels)
    loss = jax.block_until_ready(loss)
    assert loss.shape == ()

    ref = center_loss_ref(x, centers, labels)
    if not bool(jnp.allclose(loss, ref, rtol=1e-3, atol=1e-2)):
        raise AssertionError(
            f"kernel/reference mismatch: {float(loss)} vs {float(ref)}")
    print("KERNEL_OK")
</pallas_src>

<mosaic_0001>
module attributes {stable_mosaic.version = 11 : i64} {
  func.func @center_loss_kernel(%arg0: i32, %arg1: memref<8x32xf32, #tpu.memory_space<vmem>>, %arg2: memref<8x1xi32, #tpu.memory_space<vmem>>, %arg3: memref<10x32xf32, #tpu.memory_space<vmem>>, %arg4: memref<1x1xf32, #tpu.memory_space<vmem>>) attributes {dimension_semantics = [#tpu.dimension_semantics<arbitrary>], iteration_bounds = array<i64: 2>, scalar_prefetch = 0 : i64, scratch_operands = 0 : i64, tpu.core_type = #tpu.core_type<tc>, window_params = [{transform_indices = @transform_0, window_bounds = array<i64: 8, 32>}, {transform_indices = @transform_1, window_bounds = array<i64: 8, 1>}, {pipeline_mode = #tpu.pipeline_mode<synchronous>, transform_indices = @transform_2, window_bounds = array<i64: 10, 32>}, {pipeline_mode = #tpu.pipeline_mode<synchronous>, transform_indices = @transform_3, window_bounds = array<i64: 1, 1>}]} {
    %c0_i32 = arith.constant 0 : i32
    %0 = arith.cmpi eq, %arg0, %c0_i32 : i32
    %1 = arith.extui %0 : i1 to i32
    %c0_i32_0 = arith.constant 0 : i32
    %2 = arith.cmpi ne, %1, %c0_i32_0 : i32
    scf.if %2 {
      %cst_19 = arith.constant 0.000000e+00 : f32
      %39 = vector.broadcast %cst_19 : f32 to vector<1x1xf32>
      %c0_20 = arith.constant 0 : index
      %c0_21 = arith.constant 0 : index
      %40 = vector.load %arg4[%c0_20, %c0_21] : memref<1x1xf32, #tpu.memory_space<vmem>>, vector<1x1xf32>
      tpu.vector_store %arg4[%c0_20, %c0_21], %39 {strides = array<i32>} : memref<1x1xf32, #tpu.memory_space<vmem>>, vector<1x1xf32>,
    } else {
    }
    %c0 = arith.constant 0 : index
    %c0_1 = arith.constant 0 : index
    %3 = vector.load %arg1[%c0, %c0_1] : memref<8x32xf32, #tpu.memory_space<vmem>>, vector<8x32xf32>
    %c0_2 = arith.constant 0 : index
    %c0_3 = arith.constant 0 : index
    %4 = vector.load %arg3[%c0_2, %c0_3] : memref<10x32xf32, #tpu.memory_space<vmem>>, vector<10x32xf32>
    %5 = arith.mulf %3, %3 : vector<8x32xf32>
    %cst = arith.constant dense<0.000000e+00> : vector<8xf32>
    %6 = vector.multi_reduction <add>, %5, %cst [1] : vector<8x32xf32> to vector<8xf32>
    %7 = vector.shape_cast %6 : vector<8xf32> to vector<8x1xf32>
    %cst_4 = arith.constant 1.000000e+00 : f32
    %8 = vector.broadcast %cst_4 : f32 to vector<1x32xf32>
    %9 = arith.mulf %4, %4 : vector<10x32xf32>
    %cst_5 = arith.constant dense<0.000000e+00> : vector<1x10xf32>
    %10 = tpu.matmul %8, %9, %cst_5 {dimension_numbers = #tpu.dot_dimension_numbers<[1], [1], [0], [0], [0, 0, 1, 0], [], []>} : vector<1x32xf32>, vector<10x32xf32>, vector<1x10xf32> -> vector<1x10xf32>
    %cst_6 = arith.constant dense<0.000000e+00> : vector<8x10xf32>
    %11 = tpu.matmul %3, %4, %cst_6 {dimension_numbers = #tpu.dot_dimension_numbers<[1], [1], [0], [0], [0, 0, 1, 0], [], []>} : vector<8x32xf32>, vector<10x32xf32>, vector<8x10xf32> -> vector<8x10xf32>
    %12 = vector.broadcast %7 : vector<8x1xf32> to vector<8x10xf32>
    %13 = vector.broadcast %10 : vector<1x10xf32> to vector<8x10xf32>
    %14 = arith.addf %12, %13 : vector<8x10xf32>
    %cst_7 = arith.constant 2.000000e+00 : f32
    %15 = vector.broadcast %cst_7 : f32 to vector<8x10xf32>
    %16 = arith.mulf %15, %11 : vector<8x10xf32>
    %17 = arith.subf %14, %16 : vector<8x10xf32>
    %18 = tpu.iota {dimensions = array<i32: 1>} : vector<8x10xi32>
    %c0_8 = arith.constant 0 : index
    %c0_9 = arith.constant 0 : index
    %19 = vector.load %arg2[%c0_8, %c0_9] : memref<8x1xi32, #tpu.memory_space<vmem>>, vector<8x1xi32>
    %20 = vector.broadcast %19 : vector<8x1xi32> to vector<8x10xi32>
    %21 = arith.cmpi eq, %20, %18 : vector<8x10xi32>
    %cst_10 = arith.constant 0.000000e+00 : f32
    %22 = vector.broadcast %cst_10 : f32 to vector<8x10xf32>
    %23 = arith.select %21, %17, %22 : vector<8x10xi1>, vector<8x10xf32>
    %cst_11 = arith.constant 9.99999996E-13 : f32
    %cst_12 = arith.constant 9.99999995E+11 : f32
    %24 = vector.broadcast %cst_11 : f32 to vector<8x10xf32>
    %25 = arith.maximumf %24, %23 : vector<8x10xf32>
    %26 = vector.broadcast %cst_12 : f32 to vector<8x10xf32>
    %27 = arith.minimumf %26, %25 : vector<8x10xf32>
    %c0_13 = arith.constant 0 : index
    %c0_14 = arith.constant 0 : index
    %28 = vector.load %arg4[%c0_13, %c0_14] : memref<1x1xf32, #tpu.memory_space<vmem>>, vector<1x1xf32>
    %29 = vector.shape_cast %27 : vector<8x10xf32> to vector<1x8x10xf32>
    %cst_15 = arith.constant dense<0.000000e+00> : vector<1xf32>
    %30 = vector.multi_reduction <add>, %29, %cst_15 [1, 2] : vector<1x8x10xf32> to vector<1xf32>
    %31 = vector.shape_cast %30 : vector<1xf32> to vector<1x1x1xf32>
    %32 = vector.extract %31[0, 0, 0] : f32 from vector<1x1x1xf32>
    %33 = vector.broadcast %32 : f32 to vector<1x1xf32>
    %34 = arith.addf %28, %33 : vector<1x1xf32>
    %c0_16 = arith.constant 0 : index
    %c0_17 = arith.constant 0 : index
    %35 = vector.load %arg4[%c0_16, %c0_17] : memref<1x1xf32, #tpu.memory_space<vmem>>, vector<1x1xf32>
    tpu.vector_store %arg4[%c0_16, %c0_17], %34 {strides = array<i32>} : memref<1x1xf32, #tpu.memory_space<vmem>>, vector<1x1xf32>,
    %c1_i32 = arith.constant 1 : i32
    %36 = arith.cmpi eq, %arg0, %c1_i32 : i32
    %37 = arith.extui %36 : i1 to i32
    %c0_i32_18 = arith.constant 0 : i32
    %38 = arith.cmpi ne, %37, %c0_i32_18 : i32
    scf.if %38 {
      %c0_19 = arith.constant 0 : index
      %c0_20 = arith.constant 0 : index
      %39 = vector.load %arg4[%c0_19, %c0_20] : memref<1x1xf32, #tpu.memory_space<vmem>>, vector<1x1xf32>
      %cst_21 = arith.constant 6.250000e-02 : f32
      %40 = vector.broadcast %cst_21 : f32 to vector<1x1xf32>
      %41 = arith.mulf %39, %40 : vector<1x1xf32>
      %c0_22 = arith.constant 0 : index
      %c0_23 = arith.constant 0 : index
      %42 = vector.load %arg4[%c0_22, %c0_23] : memref<1x1xf32, #tpu.memory_space<vmem>>, vector<1x1xf32>
      tpu.vector_store %arg4[%c0_22, %c0_23], %41 {strides = array<i32>} : memref<1x1xf32, #tpu.memory_space<vmem>>, vector<1x1xf32>,
    } else {
    }
    return
  }
  func.func @transform_0(%arg0: i32) -> (i32, i32) {
    %c0_i32 = arith.constant 0 : i32
    %c0_i32_0 = arith.constant 0 : i32
    return %arg0, %c0_i32 : i32, i32
  }
  func.func @transform_1(%arg0: i32) -> (i32, i32) {
    %c0_i32 = arith.constant 0 : i32
    %c0_i32_0 = arith.constant 0 : i32
    return %arg0, %c0_i32 : i32, i32
  }
  func.func @transform_2(%arg0: i32) -> (i32, i32) {
    %c0_i32 = arith.constant 0 : i32
    %c0_i32_0 = arith.constant 0 : i32
    %c0_i32_1 = arith.constant 0 : i32
    return %c0_i32, %c0_i32_0 : i32, i32
  }
  func.func @transform_3(%arg0: i32) -> (i32, i32) {
    %c0_i32 = arith.constant 0 : i32
    %c0_i32_0 = arith.constant 0 : i32
    %c0_i32_1 = arith.constant 0 : i32
    return %c0_i32, %c0_i32_0 : i32, i32
  }
}

</mosaic_0001>

<bundles_post_ra>
// kernel: center_loss.1
= control target key start
LH: loop header
LB: loop body
LE: loop exit
PB: predicated region body
PF: predicated region fallthrough
CT: control target
= control target key end

     0   :  { %8 = vsyncpa [#allocation3], 0  ;;  %s746_s0 = inlined_call_operand.vmem [shape: f32[16,32], index: 0, kind: input, shape index: {}]   ;;  %s747_s1 = inlined_call_operand.vmem [shape: s32[16,1], index: 1, kind: input, shape index: {}]   ;;  %s748_s2 = inlined_call_operand.hbm [shape: f32[10,32], index: 2, kind: input, shape index: {}]   ;;  %s749_s3 = inlined_call_operand.hbm [shape: f32[1,1], index: 3, kind: output, shape index: {}]  }
   0x1   :  { %9 = vsyncpa [#allocation4], 0  ;;  %s655_s12 = smov 0  }
   0x2 LB: > { %s661_s13 = sadd.s32 4294967295, %s623_s12   ;;  %p471_p0 = scmp.ge.s32.totalorder %s623_s12, 1  ;;  %s623_s12 = sphi %s655_s12, %s15_s12  }
   0x3   : > { %p114_p1 = scmp.lt.s32.totalorder %s623_s12, 3  ;;  %s625_s14 = smov [#allocation2]  }
   0x4   : > { %s126_s15 = sshll.u32 %s625_s14, 4  ;;  %p750_p4 = scmp.eq.s32.totalorder %s661_s13, 0  ;;  %s127_s15 = int_to_ptr.vmem [resolvable:$true] %s126_s15 }
   0x5   : > { %p666_p3 = pnand %p471_p0, %p114_p1  ;;  %s555_s20 = scalar_lea.hbm %s748_s2, 256 }
   0x6   : > { %p556_p7 = scmp.ne.s32.totalorder %s748_s2, %s555_s20  ;;  %p562_p11 = scmp.lt.u32.totalorder %s555_s20, %s748_s2 }
   0x7   : > { %s752_s16 = scalar_select %p666_p3, 1, 0 }
   0x8   : > { %p528_p5 = pneg %p666_p3 }
   0xa   : > { %p675_p6 = pnand %p750_p4, %p528_p5 }
   0xc   : > { %p557_p8 = pneg %p675_p6 }
   0xe   : > { %p558_p9 = pnand %p557_p8, %p556_p7 }
  0x10   : > { %p559_p10 = pneg %p558_p9 }
  0x12   : > { %p564_p12 = pnand %p562_p11, %p559_p10 }
  0x14   : > { %567 = shalt.err (!%p564_p12)
}
  0x15   : > { %s568_s25 = scalar_lea.vmem %s127_s15, 256  ;;  %p576_p5 = scmp.lt.s32.totalorder %s127_s15, %s127_s15 }
  0x16   : > { %p569_p13 = scmp.ne.s32.totalorder %s127_s15, %s568_s25  ;;  %p577_p2 = scmp.lt.s32.totalorder %s568_s25, %s568_s25 }
  0x18   : > { %p571_p0 = pnand %p569_p13, %p557_p8  ;;  %p578_p4 = por %p577_p2, %p576_p5 }
  0x1a   : > { %p572_p1 = pneg %p571_p0 }
  0x1c   : > { %p579_p3 = pnand %p578_p4, %p572_p1 }
  0x1e   : > { %582 = shalt.err (!%p579_p3)
}
  0x1f   : > { %s626_s26 = smov 128   ;;  %s627_s27 = smov 8  }
  0x20   : > { %531 = dma.hbm_to_vmem [thread:$0]  (!%p675_p6), %s748_s2, 256, %s127_s15, [#allocation3], %s626_s26, %s626_s26, %s627_s27  }
  0x21   : > { %p754_p7 = scmp.ne.s32.totalorder %s752_s16, 0 }
  0x22   : > { %p755_p9 = scmp.eq.s32.totalorder (!%p754_p7), %s661_s13, 0 }
  0x23   : > { %156 = sbr.rel (%p754_p7) target bundleno = 532 (0x214), region = 32 }
  0x2a   : > { %614 = dma.done.wait (%p755_p9), [#allocation3], 256   ;;  %p756_p8 = pmov %p755_p9 }
  0x2b   : > { %p178_p2 = scmp.lt.s32.totalorder %s661_s13, 1  ;;  %p757_p3 = scmp.ne.s32.totalorder %s661_s13, 0 }
  0x2c   : > { %616 = vsyncadd (%p756_p8), [#allocation3], 4294967040  ;;  %vm190_vm0 = vcmask (!%p757_p3), 0   ;;  %v628_v0 = vmov (!%p757_p3), 0.0  }
  0x2d   : > { %s179_s30 = scalar_select %p178_p2, %s661_s13, 1 }
  0x2e   : > { %189 = sbr.rel (%p757_p3) target bundleno = 53 (0x35), region = 40  ;;  %191 = vst.msk [vmem:[#allocation5] sm:$0x1] (!%p757_p3), %vm190_vm0, %v628_v0 }
  0x2f   : > { %s476_s4 = sshll.u32 %s179_s30, 3 }
  0x30   : > { %s181_s7 = scalar_lea.vmem %s746_s0, %s476_s4  ;;  %s709_s10 = scalar_lea.vmem %s747_s1, %s476_s4 }
  0x35 PF: > { %v193_v1 = vld [vmem:[#allocation2] sm:$0xff]  ;;  %v194_v2 = vld [vmem:[#allocation2 + $0x8] sm:$0x3]  ;;  %vm196_vm1 = vcmask 261120   ;;  %v629_v3 = vmov 0.0|0.0   ;;  %vm630_vm3 = vmmov 0   ;;  %v360_v15 = vlaneseq }
  0x36   : > { %510 = vmatprep.subr.bf16.mxu0 %v629_v3  ;;  %v200_v4 = vmul.f32 %v193_v1, %v193_v1  ;;  %v201_v5 = vmul.f32 %v194_v2, %v194_v2  ;;  %vm512_vm2 = vmpackc.low %vm196_vm1, %vm196_vm1  ;;  %514 = vmatprep.subr.bf16.mxu1 %v629_v3  ;;  %v515_v6 = vpack.c.bf16 %v194_v2, %v193_v1  ;;  %v192_v7 = vld [vmem:[%s181_s7] sm:$0xff]  ;;  %v631_v8 = vmov 0.0   ;;  %v377_v40 = vld [vmem:[#allocation5] sm:$0x1]  ;;  %p485_p4 = scmp.ne.s32.totalorder %s661_s13, 1 }
  0x37   : > { %500 = vmatprep.mubr.msk.f32.mxu0 %vm630_vm3, %v631_v8  ;;  %507 = vmatprep.mubr.msk.f32.mxu1 %vm630_vm3, %v631_v8  ;;  %v195_v9 = vmul.f32 %v192_v7, %v192_v7  ;;  %v632_v11 = vmov 0   ;;  %v633_v13 = vmov 1.0   ;;  %v369_v14 = vld [vmem:[%s709_s10] sm:$0xff]  ;;  %v361_v16 = vshrl.u32 %v360_v15, 7 }
  0x38   : > { %v511_v10 = vpack.c.bf16 %v201_v5, %v200_v4  ;;  %517 = vmatpush3.bf16.xpose.msk.msra.mxu1 %vm512_vm2, %v515_v6  ;;  %554 = vset.pattern.permute.xlu0 %v632_v11  ;;  %v368_v22 = vand.u32 127, %v360_v15  ;;  %vm378_vm5 = vcmask 80896   ;;  %vm391_vm6 = vcmask 0  }
  0x39   : > { %v197_v12 = vsel %vm196_vm1, %v195_v9, 0.0  ;;  %v362_v18 = vsub.s32 0, %v361_v16 }
  0x3a   : > { %513 = vmatpush3.bf16.xpose.msk.msra.mxu0 %vm512_vm2, %v511_v10  ;;  %198 = vadd.xlane.f32.xlu0 %v197_v12 }
  0x3f   : > { %508 = vmatmul.mubr.msk.f32.vlgmr.msra.gmra.mrb[0].mxu1 %vm196_vm1, %v192_v7 }
  0x41   : > { %501 = vmatmul.mubr.msk.f32.vlgmr.msra.gmra.mrb[0].mxu0 %vm196_vm1, %v633_v13 }
  0x50   : > { %371 = vperm.xlu0 %554, %v369_v14  }
  0xc7   : > { %v199_v17 = vpop.xlane.xlu0 %198 }
  0xcf   : > { %v372_v26 = vpop.permute.xlu0 %371 }
  0xd0   : > { %vm373_vm4 = vcmp.eq.s32.totalorder %v372_v26, %v368_v22 }
 0x112   : > { %v356_v19 = vpop.f32.mrb[0].mxu1 }
 0x113   : > { %v509_v20 = vpop.f32.mrb[1].mxu1  ;;  %v365_v25 = vmul.f32 2.0, %v356_v19 }
 0x114   : > { %v277_v21 = vpop.f32.mrb[0].mxu0 }
 0x115   : > { %v363_v23 = vrot.slane %v277_v21, %v362_v18  ;;  %v502_v24 = vpop.f32.mrb[1].mxu0 }
 0x117   : > { %v364_v27 = vadd.f32 %v363_v23, %v199_v17 }
 0x119   : > { %v366_v28 = vsub.f32 %v364_v27, %v365_v25 }
 0x11b   : > { %v374_v29 = vsel %vm373_vm4, %v366_v28, 0.0 }
 0x11c   : > { %v375_v30 = vmax.f32 %v374_v29, 1e-12 }
 0x11e   : > { %v376_v31 = vmin.f32 %v375_v30, 1e+12 }
 0x120   : > { %v379_v32 = vsel %vm378_vm5, %v376_v31, 0.0 }
 0x121   : > { %380 = vadd.xlane.f32.xlu1 %v379_v32 }
 0x1ae   : > { %v381_v33 = vpop.xlane.xlu1 %380 }
 0x1af   : > { %v382_v34 = vrot.slane %v381_v33, 4 }
 0x1b1   : > { %v383_v35 = vadd.f32 %v382_v34, %v381_v33 }
 0x1b3   : > { %v384_v36 = vrot.slane %v383_v35, 2 }
 0x1b5   : > { %v385_v37 = vadd.f32 %v384_v36, %v383_v35 }
 0x1b7   : > { %v386_v38 = vrot.slane %v385_v37, 1 }
 0x1b9   : > { %v387_v39 = vadd.f32 %v386_v38, %v385_v37 }
 0x1bb   : > { %518 = vpush %v387_v39 }
 0x1ea   : > { %396 = sbr.rel (%p485_p4) target bundleno = 507 (0x1fb), region = 44 }
 0x1ec   : > { %s519_s11 = spop %518 }
 0x1ed   : > { %v389_v41 = vstv %s519_s11 }
 0x1ee   : > { %v390_v42 = vadd.f32 %v389_v41, %v377_v40 }
 0x1f0   : > { %392 = vst.msk [vmem:[#allocation5] sm:$0x1] %vm391_vm6, %v390_v42 }
 0x1f7   : > { %v397_v43 = vld [vmem:[#allocation5] sm:$0x1] }
 0x1f8   : > { %v398_v44 = vmul.f32 0.0625, %v397_v43 }
 0x1fa   : > { %399 = vst.msk [vmem:[#allocation5] sm:$0x1] %vm391_vm6, %v398_v44 }
 0x1fb PF: > { %p534_p6 = scmp.eq.s32.totalorder %s661_s13, 1  ;;  %s634_s14 = smov [#allocation5]  }
 0x1fc   : > { %s407_s15 = sshll.u32 %s634_s14, 4  ;;  %s408_s15 = int_to_ptr.vmem [resolvable:$true] %s407_s15 }
 0x1fd   : > { %s583_s16 = scalar_lea.vmem %s408_s15, 16  ;;  %s589_s17 = scalar_lea.vmem %s408_s15, 32 }
 0x1fe   : > { %p584_p10 = scmp.ne.s32.totalorder %s408_s15, %s583_s16  ;;  %p590_p13 = scmp.lt.s32.totalorder %s408_s15, %s408_s15 }
 0x1ff   : > { %p591_p0 = scmp.lt.s32.totalorder %s589_s17, %s583_s16 }
 0x200   : > { %p585_p11 = pnand %p584_p10, %p534_p6 }
 0x201   : > { %p592_p1 = por %p591_p0, %p590_p13 }
 0x202   : > { %p586_p12 = pneg %p585_p11 }
 0x204   : > { %p593_p5 = pnand %p592_p1, %p586_p12 }
 0x206   : > { %596 = shalt.err (!%p593_p5)
}
 0x207   : > { %s597_s20 = scalar_lea.hbm %s749_s3, 16 }
 0x208   : > { %p598_p7 = scmp.ne.s32.totalorder %s749_s3, %s597_s20  ;;  %p603_p2 = scmp.lt.u32.totalorder %s597_s20, %s749_s3 }
 0x20a   : > { %p599_p9 = pnand %p598_p7, %p534_p6 }
 0x20c   : > { %p600_p8 = pneg %p599_p9 }
 0x20e   : > { %p605_p3 = pnand %p603_p2, %p600_p8 }
 0x210   : > { %608 = shalt.err (!%p605_p3)
}
 0x211   : > { %525 = dma.vmem_to_hbm [thread:$0]  (%p534_p6), %s408_s15, 16, %s749_s3, [#allocation4]  }
 0x212   : > { %618 = dma.done.wait (%p534_p6), [#allocation4], 16  }
 0x213   : > { %620 = vsyncadd (%p534_p6), [#allocation4], 4294967280 }
 0x214 PF: > { %s15_s12 = sadd.s32 1, %s623_s12  }
 0x215   : > { %p12_p4 = scmp.ge.s32.totalorder %s15_s12, 4  }
 0x217   :  { %14 = sbr.rel (!%p12_p4) target bundleno = 2 (0x2), region = 75 }
 0x21e   :  { %420 = vsyncpa [#allocation3], 1 }
 0x21f   :  { %422 = vsyncpa [#allocation3 + $0x1], 1 }
 0x220   :  { %423 = vsyncpa [#allocation4], 1 }
 0x221   :  { %425 = vsyncpa [#allocation4 + $0x1], 1 }

</bundles_post_ra>
